<compile_context>
chip_gen: v6e
topology: v6e:2x2x1
jax: 0.10.0
libtpu: 0.0.40
codegen_flags: <defaults>
</compile_context>

<pallas_src>
import functools

import jax
import jax.numpy as jnp
from jax import lax
from jax.experimental import pallas as pl
from jax.experimental.pallas import tpu as pltpu


LANE = 128          # TPU lane width; the K (patch) dim is padded to a multiple
TM_MAX = 1024       # cap on GEMM rows per grid step (per-step VMEM ~2.7 MiB)
MIN_BLOCKS = 2      # v7x has 2 TensorCores; >=2 parallel blocks feeds both.
                    # (On single-TC v5e/v6e the extra step costs ~0.35 us.)


def conv_gemm_kernel(col_ref, w_ref, out_ref):
    """One M-tile of the conv-as-GEMM: out = relu(col @ w).

    The bias is folded into the matmul (padded K lanes of `col` are 1.0 and the
    matching row of `w` holds the bias), so there is no separate VPU add.
    bf16 operands, f32 accumulation on the MXU.
    """
    out_ref[...] = jnp.maximum(
        jnp.dot(col_ref[...], w_ref[...], preferred_element_type=jnp.float32),
        0.0)


@functools.partial(jax.jit, static_argnames=("channels_last",))
def conv_layer_forward(x, w, b, *, channels_last=False):
    """relu(conv2d(x, w, stride=1, padding='VALID') + b).

    x: (B, CIN, IH, IW) f32, w: (CO, CIN, KH, KW) f32, b: (CO,) f32.
    Returns NCHW f32 (PyTorch parity); channels_last=True returns NHWC and
    skips the final transpose (preferred layout for a fused TPU consumer).
    """
    B, CIN, IH, IW = x.shape
    CO, _, KH, KW = w.shape
    OH, OW = IH - KH + 1, IW - KW + 1
    KD = CIN * KH * KW
    M = B * OH * OW

    # K padded to full lanes, with room for the folded-bias column(s).
    KDp = pl.cdiv(KD + 1, LANE) * LANE
    # M tiling: smallest multiple of 8 that covers M in MIN_BLOCKS blocks
    # (800 -> tm=400, 2 blocks, zero pad rows), capped for large inputs.
    tm = max(8, min(TM_MAX, pl.cdiv(M, MIN_BLOCKS * 8) * 8))
    grid_m = pl.cdiv(M, tm)
    Mp = grid_m * tm

    # ---- patch extraction: ONE fused XLA producer (no 81-slice im2col) ------
    # TODO(synk): pull the patch gather fully in-kernel once Mosaic supports the
    # required minor-dim reshape; until then a single conv_general_dilated_patches
    # op (channel-last, so the reshape below is free) feeds the pallas_call.
    xb = x.astype(jnp.bfloat16)                      # bf16 operands everywhere
    patches = lax.conv_general_dilated_patches(
        xb, filter_shape=(KH, KW), window_strides=(1, 1), padding="VALID",
        dimension_numbers=("NCHW", "OIHW", "NHWC"))   # (B, OH, OW, KD)
    col = patches.reshape(M, KD)
    if Mp != M:
        col = jnp.pad(col, ((0, Mp - M), (0, 0)))
    # Padded K lanes are 1.0 so the bias row of w_mat is applied by the same
    # MXU pass (the remaining padded rows of w_mat are zero).
    col = jnp.concatenate(
        [col, jnp.ones((Mp, KDp - KD), jnp.bfloat16)], axis=1)      # (Mp, KDp)

    w_mat = jnp.concatenate(
        [w.reshape(CO, KD).T,                        # (KD, CO) conv weights
         b.reshape(1, CO),                           # folded bias row
         jnp.zeros((KDp - KD - 1, CO), w.dtype)],    # remaining padded K rows
        axis=0).astype(jnp.bfloat16)                 # (KDp, CO)

    cost = pl.CostEstimate(
        flops=2 * Mp * KDp * CO,
        transcendentals=0,
        bytes_accessed=(Mp * KDp + KDp * CO) * 2 + Mp * CO * 4)

    out = pl.pallas_call(
        conv_gemm_kernel,
        out_shape=jax.ShapeDtypeStruct((Mp, CO), jnp.float32),
        grid=(grid_m,),
        in_specs=[
            pl.BlockSpec((tm, KDp), lambda i: (i, 0)),   # patch-row tile
            pl.BlockSpec((KDp, CO), lambda i: (0, 0)),   # weights+bias (resident)
        ],
        out_specs=pl.BlockSpec((tm, CO), lambda i: (i, 0)),
        compiler_params=pltpu.CompilerParams(
            dimension_semantics=("parallel",),
            allow_input_fusion=[True, True]),
        cost_estimate=cost,
    )(col, w_mat)

    if Mp != M:
        out = out[:M]
    out = out.reshape(B, OH, OW, CO)
    if channels_last:
        return out
    # NCHW for PyTorch parity (one extra ~1.6 MB HBM round trip; a fused TPU
    # consumer should request channels_last=True instead).
    return jnp.transpose(out, (0, 3, 1, 2))


def reference_forward(x, w, b):
    """Pure-JAX f32 reference mirroring the PyTorch module."""
    out = lax.conv_general_dilated(
        x, w, window_strides=(1, 1), padding="VALID",
        dimension_numbers=("NCHW", "OIHW", "NCHW"),
        precision=lax.Precision.HIGHEST)
    return jnp.maximum(out + b[None, :, None, None], 0.0)


def init_params(key, cin, cout, k):
    """PyTorch Conv2d default init: uniform(-1/sqrt(fan_in), 1/sqrt(fan_in))."""
    kw_key, kb_key = jax.random.split(key)
    fan_in = cin * k * k
    bound = 1.0 / float(fan_in) ** 0.5
    w = jax.random.uniform(kw_key, (cout, cin, k, k), jnp.float32, -bound, bound)
    b = jax.random.uniform(kb_key, (cout,), jnp.float32, -bound, bound)
    return w, b


if __name__ == "__main__":
    key = jax.random.PRNGKey(0)
    kx, kp = jax.random.split(key)

    B, CIN, IH, IW = 2, 1, 28, 28        # capsnet-style MNIST-sized input
    CO, K = 256, 9                       # ConvLayer defaults

    x = jax.random.normal(kx, (B, CIN, IH, IW), jnp.float32)
    w, b = init_params(kp, CIN, CO, K)

    out = conv_layer_forward(x, w, b)    # default: NCHW, PyTorch parity
    jax.block_until_ready(out)

    ref = reference_forward(x, w, b)
    assert out.shape == (B, CO, IH - K + 1, IW - K + 1)
    max_err = float(jnp.max(jnp.abs(out - ref)))
    # bf16 operands + f32 accumulation: error is input-rounding dominated,
    # well inside the same tolerance the default-precision f32 path needed.
    assert jnp.allclose(out, ref, atol=1e-2, rtol=1e-2), max_err

    print("KERNEL_OK")
</pallas_src>

<mosaic_0001>
module attributes {stable_mosaic.version = 11 : i64} {
  func.func @conv_gemm_kernel(%arg0: i32, %arg1: memref<400x128xbf16, #tpu.memory_space<vmem>>, %arg2: memref<128x256xbf16, #tpu.memory_space<vmem>>, %arg3: memref<400x256xf32, #tpu.memory_space<vmem>>) attributes {dimension_semantics = [#tpu.dimension_semantics<parallel>], iteration_bounds = array<i64: 2>, scalar_prefetch = 0 : i64, scratch_operands = 0 : i64, tpu.core_type = #tpu.core_type<tc>, window_params = [{transform_indices = @transform_0, window_bounds = array<i64: 400, 128>}, {pipeline_mode = #tpu.pipeline_mode<synchronous>, transform_indices = @transform_1, window_bounds = array<i64: 128, 256>}, {transform_indices = @transform_2, window_bounds = array<i64: 400, 256>}]} {
    %c0 = arith.constant 0 : index
    %c0_0 = arith.constant 0 : index
    %0 = vector.load %arg1[%c0, %c0_0] : memref<400x128xbf16, #tpu.memory_space<vmem>>, vector<400x128xbf16>
    %c0_1 = arith.constant 0 : index
    %c0_2 = arith.constant 0 : index
    %1 = vector.load %arg2[%c0_1, %c0_2] : memref<128x256xbf16, #tpu.memory_space<vmem>>, vector<128x256xbf16>
    %cst = arith.constant dense<0.000000e+00> : vector<400x256xf32>
    %2 = tpu.matmul %0, %1, %cst {dimension_numbers = #tpu.dot_dimension_numbers<[1], [0], [0], [1], [0, 0, 1, 1], [], []>} : vector<400x128xbf16>, vector<128x256xbf16>, vector<400x256xf32> -> vector<400x256xf32>
    %cst_3 = arith.constant 0.000000e+00 : f32
    %3 = vector.broadcast %cst_3 : f32 to vector<400x256xf32>
    %4 = arith.maximumf %2, %3 : vector<400x256xf32>
    %c0_4 = arith.constant 0 : index
    %c0_5 = arith.constant 0 : index
    %5 = vector.load %arg3[%c0_4, %c0_5] : memref<400x256xf32, #tpu.memory_space<vmem>>, vector<400x256xf32>
    tpu.vector_store %arg3[%c0_4, %c0_5], %4 {strides = array<i32>} : memref<400x256xf32, #tpu.memory_space<vmem>>, vector<400x256xf32>,
    return
  }
  func.func @transform_0(%arg0: i32) -> (i32, i32) {
    %c0_i32 = arith.constant 0 : i32
    %c0_i32_0 = arith.constant 0 : i32
    return %arg0, %c0_i32 : i32, i32
  }
  func.func @transform_1(%arg0: i32) -> (i32, i32) {
    %c0_i32 = arith.constant 0 : i32
    %c0_i32_0 = arith.constant 0 : i32
    %c0_i32_1 = arith.constant 0 : i32
    return %c0_i32, %c0_i32_0 : i32, i32
  }
  func.func @transform_2(%arg0: i32) -> (i32, i32) {
    %c0_i32 = arith.constant 0 : i32
    %c0_i32_0 = arith.constant 0 : i32
    return %arg0, %c0_i32 : i32, i32
  }
}

</mosaic_0001>

<bundles_post_ra>
// kernel: conv_layer_forward.2
= control target key start
LH: loop header
LB: loop body
LE: loop exit
PB: predicated region body
PF: predicated region fallthrough
CT: control target
= control target key end

     0   :  { %s3452_s25 = smov 0   ;;  %s3955_s0 = inlined_call_operand.vmem [shape: bf16[800,81], index: 0, kind: input, shape index: {}]   ;;  %s3956_s1 = inlined_call_operand.<no memory space> [shape: bf16[], index: 1, kind: input, shape index: {}]   ;;  %s3957_s2 = inlined_call_operand.vmem [shape: bf16[1,256], index: 2, kind: input, shape index: {}]   ;;  %s3958_s3 = inlined_call_operand.<no memory space> [shape: bf16[], index: 3, kind: input, shape index: {}]   ;;  %s3959_s4 = inlined_call_operand.vmem [shape: bf16[81,256], index: 4, kind: input, shape index: {}]   ;;  %s3960_s5 = inlined_call_operand.vmem [shape: bf16[128], index: 5, kind: input, shape index: {}]   ;;  %s3961_s6 = inlined_call_operand.vmem [shape: f32[800,256], index: 6, kind: output, shape index: {}]  }
   0x1   :  { %v11_v0 = vstv %s3956_s1  ;;  %v16_v1 = vstv %s3958_s3 }
   0x2   :  { %v3448_v2 = vunpack.i.l.bf16 %v11_v0  ;;  %v3450_v3 = vunpack.i.l.bf16 %v16_v1 }
   0x3 LB: > { %s3180_s26 = sadd.s32 4294967295, %s3403_s25   ;;  %p3185_p0 = scmp.ge.s32.totalorder %s3403_s25, 1  ;;  %s3403_s25 = sphi %s3452_s25, %s31_s25  }
   0x4   : > { %p199_p1 = scmp.lt.s32.totalorder %s3403_s25, 3 }
   0x6   : > { %p200_p2 = pnand %p3185_p0, %p199_p1 }
   0x8   : > { %203 = sbr.rel (%p200_p2) target bundleno = 474 (0x1da), region = 36 }
   0xd   : > { %v2255_v4 = vld [vmem:[%s3960_s5] ss:$0 sm:$0xff]  ;;  %s234_s27 = smul.u32 50, %s3180_s26  ;;  %v271_v6 = vlaneseq  ;;  %v3405_v16 = vmov 0.0   ;;  %v3406_v30 = vmov 0   ;;  %vm2058_vm2 = vcmask 1046528  }
   0xe   : > { %v2256_v5 = vunpack.i.l.bf16 %v2255_v4  ;;  %2656 = vmatprep.mubr.bf16.mxu0 %v3406_v30  ;;  %2786 = vmatprep.mubr.bf16.mxu1 %v3406_v30 }
   0xf   : > { %p235_p3 = scmp.lt.s32.totalorder %s234_s27, 99  ;;  %v3464_v7 = vand.u32 127, %v271_v6 }
  0x10   : > { %2262 = vbcast.lane.b32.xlu0 %v2256_v5, 368  ;;  %2190 = vbcast.lane.b32.xlu1 %v2256_v5, 352 }
  0x11   : > { %s3963_s27 = smov (!%p235_p3, %s234_s27), 99  ;;  %vm274_vm0 = vcmp.lt.s32.totalorder %v3464_v7, 81 }
  0x12   : > { %s3186_s28 = sshll.u32 %s3963_s27, 2  ;;  %s3303_s10 = sshll.u32 %s3963_s27, 4 }
  0x13   : > { %s3472_s7 = scalar_lea.vmem %s3955_s0, %s3186_s28  ;;  %s3850_s13 = scalar_lea.vmem %s3961_s6, %s3303_s10 }
  0x14   : > { %2298 = vbcast.lane.b32.xlu0 %v2256_v5, 376  ;;  %2226 = vbcast.lane.b32.xlu1 %v2256_v5, 360  ;;  %v268_v8 = vld [vmem:[%s3472_s7] sm:$0xff]   ;;  %v3214_v11 = vld [vmem:[%s3472_s7 + $0x68] sm:$0xff]   ;;  %v3216_v26 = vld [vmem:[%s3472_s7 + $0x70] sm:$0xff]  }
  0x15   : > { %v269_v9 = vunpack.c.l.bf16 %v268_v8  ;;  %v291_v10 = vunpack.c.h.bf16 %v268_v8  ;;  %v866_v14 = vunpack.c.l.bf16 %v3214_v11  ;;  %v889_v15 = vunpack.c.h.bf16 %v3214_v11  ;;  %v3190_v23 = vld [vmem:[%s3472_s7 + $0x8] sm:$0xff]   ;;  %v3192_v38 = vld [vmem:[%s3472_s7 + $0x10] sm:$0xff]   ;;  %v3218_v41 = vld [vmem:[%s3472_s7 + $0x78] sm:$0xff]  }
  0x16   : > { %v314_v24 = vunpack.c.l.bf16 %v3190_v23  ;;  %v337_v25 = vunpack.c.h.bf16 %v3190_v23  ;;  %v912_v29 = vunpack.c.l.bf16 %v3216_v26  ;;  %v935_v33 = vunpack.c.h.bf16 %v3216_v26  ;;  %v3194_v52 = vld [vmem:[%s3472_s7 + $0x18] sm:$0xff]   ;;  %v3220_v55 = vld [vmem:[%s3472_s7 + $0x80] sm:$0xff]  }
  0x17   : > { %v275_v12 = vsel %vm274_vm0, %v269_v9, %v3448_v2  ;;  %v297_v13 = vsel %vm274_vm0, %v291_v10, %v3448_v2  ;;  %v872_v19 = vsel %vm274_vm0, %v866_v14, %v3448_v2  ;;  %v895_v20 = vsel %vm274_vm0, %v889_v15, %v3448_v2  ;;  %v3196_v4 = vld [vmem:[%s3472_s7 + $0x20] sm:$0xff]   ;;  %v3222_v9 = vld [vmem:[%s3472_s7 + $0x88] sm:$0xff]  }
  0x18   : > { %2151 = vbcast.lane.b32.xlu1 %v2256_v5, 344  ;;  %2086 = vbcast.lane.b32.xlu0 %v2256_v5, 336  ;;  %v276_v17 = vpack.c.bf16 %v3405_v16, %v275_v12  ;;  %v299_v18 = vpack.c.bf16 %v3405_v16, %v297_v13  ;;  %v874_v21 = vpack.c.bf16 %v3405_v16, %v872_v19  ;;  %v360_v39 = vunpack.c.l.bf16 %v3192_v38 }
  0x19   : > { %v897_v22 = vpack.c.bf16 %v3405_v16, %v895_v20  ;;  %v320_v27 = vsel %vm274_vm0, %v314_v24, %v3448_v2  ;;  %v343_v28 = vsel %vm274_vm0, %v337_v25, %v3448_v2  ;;  %v918_v34 = vsel %vm274_vm0, %v912_v29, %v3448_v2  ;;  %v3224_v24 = vld [vmem:[%s3472_s7 + $0x90] sm:$0xff]  }
  0x1a   : > { %279 = vst [vmem:[#allocation17] sm:$0xf] %v276_v17  ;;  %302 = vst [vmem:[#allocation17 + $0x4] sm:$0xf] %v299_v18  ;;  %v322_v31 = vpack.c.bf16 %v3405_v16, %v320_v27  ;;  %v345_v32 = vpack.c.bf16 %v3405_v16, %v343_v28  ;;  %v920_v35 = vpack.c.bf16 %v3405_v16, %v918_v34  ;;  %v383_v40 = vunpack.c.h.bf16 %v3192_v38 }
  0x1b   : > { %877 = vst [vmem:[#allocation17 + $0x68] sm:$0xf] %v874_v21  ;;  %900 = vst [vmem:[#allocation17 + $0x6c] sm:$0xf] %v897_v22  ;;  %v941_v36 = vsel %vm274_vm0, %v935_v33, %v3448_v2  ;;  %v366_v42 = vsel %vm274_vm0, %v360_v39, %v3448_v2  ;;  %v958_v44 = vunpack.c.l.bf16 %v3218_v41  ;;  %v981_v45 = vunpack.c.h.bf16 %v3218_v41  ;;  %v3198_v21 = vld [vmem:[%s3472_s7 + $0x28] sm:$0xff]   ;;  %v3226_v39 = vld [vmem:[%s3472_s7 + $0x98] sm:$0xff]  }
  0x1c   : > { %2006 = vbcast.lane.b32.xlu1 %v2256_v5, 328  ;;  %1934 = vbcast.lane.b32.xlu0 %v2256_v5, 320  ;;  %325 = vst [vmem:[#allocation17 + $0x8] sm:$0xf] %v322_v31  ;;  %348 = vst [vmem:[#allocation17 + $0xc] sm:$0xf] %v345_v32  ;;  %v943_v37 = vpack.c.bf16 %v3405_v16, %v941_v36  ;;  %v389_v43 = vsel %vm274_vm0, %v383_v40, %v3448_v2  ;;  %v406_v53 = vunpack.c.l.bf16 %v3194_v52 }
  0x1d   : > { %923 = vst [vmem:[#allocation17 + $0x70] sm:$0xf] %v920_v35  ;;  %v368_v46 = vpack.c.bf16 %v3405_v16, %v366_v42  ;;  %v391_v47 = vpack.c.bf16 %v3405_v16, %v389_v43  ;;  %v964_v48 = vsel %vm274_vm0, %v958_v44, %v3448_v2  ;;  %v987_v49 = vsel %vm274_vm0, %v981_v45, %v3448_v2  ;;  %v3200_v36 = vld [vmem:[%s3472_s7 + $0x30] sm:$0xff]  }
  0x1e   : > { %946 = vst [vmem:[#allocation17 + $0x74] sm:$0xf] %v943_v37  ;;  %v966_v50 = vpack.c.bf16 %v3405_v16, %v964_v48  ;;  %v989_v51 = vpack.c.bf16 %v3405_v16, %v987_v49  ;;  %v429_v54 = vunpack.c.h.bf16 %v3194_v52  ;;  %v412_v56 = vsel %vm274_vm0, %v406_v53, %v3448_v2  ;;  %v3228_v53 = vld [vmem:[%s3472_s7 + $0xa0] sm:$0xff]  }
  0x1f   : > { %371 = vst [vmem:[#allocation17 + $0x10] sm:$0xf] %v368_v46  ;;  %394 = vst [vmem:[#allocation17 + $0x14] sm:$0xf] %v391_v47  ;;  %v1004_v58 = vunpack.c.l.bf16 %v3220_v55  ;;  %v1027_v59 = vunpack.c.h.bf16 %v3220_v55  ;;  %v414_v60 = vpack.c.bf16 %v3405_v16, %v412_v56  ;;  %v475_v8 = vunpack.c.h.bf16 %v3196_v4 }
  0x20   : > { %1862 = vbcast.lane.b32.xlu1 %v2256_v5, 312  ;;  %1790 = vbcast.lane.b32.xlu0 %v2256_v5, 304  ;;  %969 = vst [vmem:[#allocation17 + $0x78] sm:$0xf] %v966_v50  ;;  %992 = vst [vmem:[#allocation17 + $0x7c] sm:$0xf] %v989_v51  ;;  %v435_v57 = vsel %vm274_vm0, %v429_v54, %v3448_v2  ;;  %v1050_v12 = vunpack.c.l.bf16 %v3222_v9  ;;  %v1073_v13 = vunpack.c.h.bf16 %v3222_v9  ;;  %v498_v22 = vunpack.c.l.bf16 %v3198_v21 }
  0x21   : > { %v437_v61 = vpack.c.bf16 %v3405_v16, %v435_v57  ;;  %v1010_v62 = vsel %vm274_vm0, %v1004_v58, %v3448_v2  ;;  %v1033_v63 = vsel %vm274_vm0, %v1027_v59, %v3448_v2  ;;  %417 = vst [vmem:[#allocation17 + $0x18] sm:$0xf] %v414_v60  ;;  %v481_v11 = vsel %vm274_vm0, %v475_v8, %v3448_v2  ;;  %v3202_v50 = vld [vmem:[%s3472_s7 + $0x38] sm:$0xff]  }
  0x22   : > { %v1012_v0 = vpack.c.bf16 %v3405_v16, %v1010_v62  ;;  %v1035_v1 = vpack.c.bf16 %v3405_v16, %v1033_v63  ;;  %v483_v15 = vpack.c.bf16 %v3405_v16, %v481_v11  ;;  %v1056_v17 = vsel %vm274_vm0, %v1050_v12, %v3448_v2 }
  0x23   : > { %440 = vst [vmem:[#allocation17 + $0x1c] sm:$0xf] %v437_v61  ;;  %v1079_v18 = vsel %vm274_vm0, %v1073_v13, %v3448_v2  ;;  %v1058_v19 = vpack.c.bf16 %v3405_v16, %v1056_v17  ;;  %v521_v23 = vunpack.c.h.bf16 %v3198_v21  ;;  %v504_v25 = vsel %vm274_vm0, %v498_v22, %v3448_v2  ;;  %v3232_v22 = vld [vmem:[%s3472_s7 + $0xb0] sm:$0xff]  }
  0x24   : > { %1718 = vbcast.lane.b32.xlu1 %v2256_v5, 296  ;;  %1655 = vbcast.lane.b32.xlu0 %v2256_v5, 288  ;;  %1015 = vst [vmem:[#allocation17 + $0x80] sm:$0xf] %v1012_v0  ;;  %1038 = vst [vmem:[#allocation17 + $0x84] sm:$0xf] %v1035_v1  ;;  %v1081_v20 = vpack.c.bf16 %v3405_v16, %v1079_v18  ;;  %v1096_v27 = vunpack.c.l.bf16 %v3224_v24  ;;  %v1119_v28 = vunpack.c.h.bf16 %v3224_v24  ;;  %v544_v37 = vunpack.c.l.bf16 %v3200_v36 }
  0x25   : > { %486 = vst [vmem:[#allocation17 + $0x24] sm:$0xf] %v483_v15  ;;  %1061 = vst [vmem:[#allocation17 + $0x88] sm:$0xf] %v1058_v19  ;;  %v527_v26 = vsel %vm274_vm0, %v521_v23, %v3448_v2  ;;  %v506_v29 = vpack.c.bf16 %v3405_v16, %v504_v25  ;;  %v567_v38 = vunpack.c.h.bf16 %v3200_v36  ;;  %v1142_v42 = vunpack.c.l.bf16 %v3226_v39  ;;  %v3204_v0 = vld [vmem:[%s3472_s7 + $0x40] sm:$0xff]   ;;  %v3206_v19 = vld [vmem:[%s3472_s7 + $0x48] sm:$0xff]  }
  0x26   : > { %1084 = vst [vmem:[#allocation17 + $0x8c] sm:$0xf] %v1081_v20  ;;  %v529_v31 = vpack.c.bf16 %v3405_v16, %v527_v26  ;;  %v1102_v32 = vsel %vm274_vm0, %v1096_v27, %v3448_v2  ;;  %v1125_v33 = vsel %vm274_vm0, %v1119_v28, %v3448_v2  ;;  %v550_v40 = vsel %vm274_vm0, %v544_v37, %v3448_v2  ;;  %v3208_v37 = vld [vmem:[%s3472_s7 + $0x50] sm:$0xff]  }
  0x27   : > { %509 = vst [vmem:[#allocation17 + $0x28] sm:$0xf] %v506_v29  ;;  %v1104_v34 = vpack.c.bf16 %v3405_v16, %v1102_v32  ;;  %v1127_v35 = vpack.c.bf16 %v3405_v16, %v1125_v33  ;;  %v573_v41 = vsel %vm274_vm0, %v567_v38, %v3448_v2  ;;  %v1165_v43 = vunpack.c.h.bf16 %v3226_v39  ;;  %v1411_v33 = vld [vmem:[%s3957_s2] ss:$0 sm:$0x3] }
  0x28   : > { %1601 = vbcast.lane.b32.xlu1 %v2256_v5, 280  ;;  %1547 = vbcast.lane.b32.xlu0 %v2256_v5, 272  ;;  %532 = vst [vmem:[#allocation17 + $0x2c] sm:$0xf] %v529_v31  ;;  %v552_v44 = vpack.c.bf16 %v3405_v16, %v550_v40  ;;  %v575_v45 = vpack.c.bf16 %v3405_v16, %v573_v41  ;;  %v590_v51 = vunpack.c.l.bf16 %v3202_v50  ;;  %v613_v52 = vunpack.c.h.bf16 %v3202_v50 }
  0x29   : > { %1107 = vst [vmem:[#allocation17 + $0x90] sm:$0xf] %v1104_v34  ;;  %1130 = vst [vmem:[#allocation17 + $0x94] sm:$0xf] %v1127_v35  ;;  %v1148_v46 = vsel %vm274_vm0, %v1142_v42, %v3448_v2  ;;  %v1171_v47 = vsel %vm274_vm0, %v1165_v43, %v3448_v2  ;;  %v1188_v56 = vunpack.c.l.bf16 %v3228_v53  ;;  %v1211_v57 = vunpack.c.h.bf16 %v3228_v53  ;;  %v3234_v42 = vld [vmem:[%s3472_s7 + $0xb8] sm:$0xff]  }
  0x2a   : > { %555 = vst [vmem:[#allocation17 + $0x30] sm:$0xf] %v552_v44  ;;  %578 = vst [vmem:[#allocation17 + $0x34] sm:$0xf] %v575_v45  ;;  %v1150_v48 = vpack.c.bf16 %v3405_v16, %v1148_v46  ;;  %v1173_v49 = vpack.c.bf16 %v3405_v16, %v1171_v47  ;;  %v596_v54 = vsel %vm274_vm0, %v590_v51, %v3448_v2  ;;  %v636_v1 = vunpack.c.l.bf16 %v3204_v0 }
  0x2b   : > { %v619_v55 = vsel %vm274_vm0, %v613_v52, %v3448_v2  ;;  %v598_v58 = vpack.c.bf16 %v3405_v16, %v596_v54  ;;  %v1194_v60 = vsel %vm274_vm0, %v1188_v56, %v3448_v2  ;;  %v1217_v61 = vsel %vm274_vm0, %v1211_v57, %v3448_v2  ;;  %v3690_v56 = vld [vmem:[%s3959_s4 + $0x48] sm:$0xff]  }
  0x2c   : > { %1493 = vbcast.lane.b32.xlu1 %v2256_v5, 264  ;;  %1430 = vbcast.lane.b32.xlu0 %v2256_v5, 256  ;;  %v452_v5 = vunpack.c.l.bf16 %v3196_v4  ;;  %1153 = vst [vmem:[#allocation17 + $0x98] sm:$0xf] %v1150_v48  ;;  %1176 = vst [vmem:[#allocation17 + $0x9c] sm:$0xf] %v1173_v49  ;;  %v621_v59 = vpack.c.bf16 %v3405_v16, %v619_v55  ;;  %v1196_v62 = vpack.c.bf16 %v3405_v16, %v1194_v60 }
  0x2d   : > { %601 = vst [vmem:[#allocation17 + $0x38] sm:$0xf] %v598_v58  ;;  %v1219_v63 = vpack.c.bf16 %v3405_v16, %v1217_v61  ;;  %v659_v4 = vunpack.c.h.bf16 %v3204_v0  ;;  %v642_v8 = vsel %vm274_vm0, %v636_v1, %v3448_v2  ;;  %v682_v20 = vunpack.c.l.bf16 %v3206_v19  ;;  %v3259_v49 = vld [vmem:[%s3959_s4 + $0x50] sm:$0xff]   ;;  %v3210_v58 = vld [vmem:[%s3472_s7 + $0x58] sm:$0xff]  }
  0x2e   : > { %v458_v10 = vsel %vm274_vm0, %v452_v5, %v3448_v2  ;;  %624 = vst [vmem:[#allocation17 + $0x3c] sm:$0xf] %v621_v59  ;;  %1199 = vst [vmem:[#allocation17 + $0xa0] sm:$0xf] %v1196_v62  ;;  %v3230_v5 = vld [vmem:[%s3472_s7 + $0xa8] sm:$0xff]   ;;  %v644_v12 = vpack.c.bf16 %v3405_v16, %v642_v8  ;;  %v705_v21 = vunpack.c.h.bf16 %v3206_v19  ;;  %v1280_v25 = vunpack.c.l.bf16 %v3232_v22  ;;  %v3236_v8 = vld [vmem:[%s3472_s7 + $0xc0] sm:$0xff]  }
  0x2f   : > { %v460_v14 = vpack.c.bf16 %v3405_v16, %v458_v10  ;;  %1222 = vst [vmem:[#allocation17 + $0xa4] sm:$0xf] %v1219_v63  ;;  %v665_v9 = vsel %vm274_vm0, %v659_v4, %v3448_v2  ;;  %v1234_v10 = vunpack.c.l.bf16 %v3230_v5  ;;  %v1257_v11 = vunpack.c.h.bf16 %v3230_v5  ;;  %v3255_v5 = vld [vmem:[%s3959_s4 + $0x40] sm:$0xff]  }
  0x30   : > { %v667_v13 = vpack.c.bf16 %v3405_v16, %v665_v9  ;;  %647 = vst [vmem:[#allocation17 + $0x40] sm:$0xf] %v644_v12  ;;  %v688_v23 = vsel %vm274_vm0, %v682_v20, %v3448_v2  ;;  %v711_v24 = vsel %vm274_vm0, %v705_v21, %v3448_v2  ;;  %v1303_v26 = vunpack.c.h.bf16 %v3232_v22 }
  0x31   : > { %463 = vst [vmem:[#allocation17 + $0x20] sm:$0xf] %v460_v14  ;;  %v1240_v14 = vsel %vm274_vm0, %v1234_v10, %v3448_v2  ;;  %v1263_v15 = vsel %vm274_vm0, %v1257_v11, %v3448_v2  ;;  %v2054_v27 = vshrl.u32 %v271_v6, 7  ;;  %v690_v28 = vpack.c.bf16 %v3405_v16, %v688_v23  ;;  %v3238_v6 = vld [vmem:[%s3957_s2 + $0x1] ss:$0 sm:$0x3] }
  0x32   : > { %670 = vst [vmem:[#allocation17 + $0x44] sm:$0xf] %v667_v13  ;;  %v1242_v17 = vpack.c.bf16 %v3405_v16, %v1240_v14  ;;  %v1265_v18 = vpack.c.bf16 %v3405_v16, %v1263_v15  ;;  %v713_v29 = vpack.c.bf16 %v3405_v16, %v711_v24  ;;  %v1286_v31 = vsel %vm274_vm0, %v1280_v25, %v3448_v2  ;;  %v3253_v15 = vld [vmem:[%s3959_s4 + $0x38] sm:$0xff]   ;;  %v3727_v24 = vld [vmem:[%s3959_s4 + $0x30] sm:$0xff]  }
  0x33   : > { %v1309_v32 = vsel %vm274_vm0, %v1303_v26, %v3448_v2  ;;  %693 = vst [vmem:[#allocation17 + $0x48] sm:$0xf] %v690_v28  ;;  %v1288_v34 = vpack.c.bf16 %v3405_v16, %v1286_v31  ;;  %v2055_v36 = vadd.s32 88, %v2054_v27  ;;  %v728_v38 = vunpack.c.l.bf16 %v3208_v37 }
  0x34   : > { %1245 = vst [vmem:[#allocation17 + $0xa8] sm:$0xf] %v1242_v17  ;;  %1268 = vst [vmem:[#allocation17 + $0xac] sm:$0xf] %v1265_v18  ;;  %v1311_v35 = vpack.c.bf16 %v3405_v16, %v1309_v32  ;;  %v751_v39 = vunpack.c.h.bf16 %v3208_v37  ;;  %v1412_v40 = vunpack.i.l.bf16 %v1411_v33  ;;  %v1450_v41 = vunpack.i.l.bf16 %v3238_v6  ;;  %v3212_v37 = vld [vmem:[%s3472_s7 + $0x60] sm:$0xff]  }
  0x35   : > { %716 = vst [vmem:[#allocation17 + $0x4c] sm:$0xf] %v713_v29  ;;  %1291 = vst [vmem:[#allocation17 + $0xb0] sm:$0xf] %v1288_v34  ;;  %v734_v43 = vsel %vm274_vm0, %v728_v38, %v3448_v2  ;;  %v1326_v45 = vunpack.c.l.bf16 %v3234_v42  ;;  %v1349_v46 = vunpack.c.h.bf16 %v3234_v42  ;;  %vm2056_vm1 = vcmp.lt.s32.totalorder %v2055_v36, 89 }
  0x36   : > { %1314 = vst [vmem:[#allocation17 + $0xb4] sm:$0xf] %v1311_v35  ;;  %v757_v44 = vsel %vm274_vm0, %v751_v39, %v3448_v2  ;;  %v736_v47 = vpack.c.bf16 %v3405_v16, %v734_v43  ;;  %v2057_v54 = vsel %vm2056_vm1, %v1412_v40, %v3450_v3  ;;  %v2106_v55 = vsel %vm2056_vm1, %v1450_v41, %v3450_v3 }
  0x37   : > { %v759_v48 = vpack.c.bf16 %v3405_v16, %v757_v44  ;;  %v1332_v50 = vsel %vm274_vm0, %v1326_v45, %v3448_v2  ;;  %v1355_v51 = vsel %vm274_vm0, %v1349_v46, %v3448_v2  ;;  %v2121_v57 = vunpack.c.h.bf16 %v3259_v49 }
  0x38   : > { %739 = vst [vmem:[#allocation17 + $0x50] sm:$0xf] %v736_v47  ;;  %v1334_v52 = vpack.c.bf16 %v3405_v16, %v1332_v50  ;;  %v1357_v53 = vpack.c.bf16 %v3405_v16, %v1355_v51  ;;  %v2072_v59 = vunpack.c.l.bf16 %v3259_v49  ;;  %v2076_v60 = vadd.s32 80, %v2054_v27 }
  0x39   : > { %762 = vst [vmem:[#allocation17 + $0x54] sm:$0xf] %v759_v48  ;;  %v774_v61 = vunpack.c.l.bf16 %v3210_v58  ;;  %v797_v62 = vunpack.c.h.bf16 %v3210_v58  ;;  %v2142_v63 = vsel %vm2058_vm2, %v3450_v3, %v2057_v54  ;;  %v2168_v0 = vsel %vm2058_vm2, %v3450_v3, %v2106_v55 }
  0x3a   : > { %1337 = vst [vmem:[#allocation17 + $0xb8] sm:$0xf] %v1334_v52  ;;  %1360 = vst [vmem:[#allocation17 + $0xbc] sm:$0xf] %v1357_v53  ;;  %v2033_v1 = vunpack.c.h.bf16 %v3690_v56  ;;  %v1992_v4 = vunpack.c.l.bf16 %v3690_v56  ;;  %v1372_v11 = vunpack.c.l.bf16 %v3236_v8  ;;  %v1395_v12 = vunpack.c.h.bf16 %v3236_v8  ;;  %v3249_v52 = vld [vmem:[%s3959_s4 + $0x28] sm:$0xff]  }
  0x3b   : > { %v780_v9 = vsel %vm274_vm0, %v774_v61, %v3448_v2  ;;  %v803_v10 = vsel %vm274_vm0, %v797_v62, %v3448_v2  ;;  %v2059_v13 = vsel %vm2058_vm2, %v2057_v54, %v3450_v3  ;;  %v2108_v14 = vsel %vm2058_vm2, %v2106_v55, %v3450_v3 }
  0x3c   : > { %v782_v17 = vpack.c.bf16 %v3405_v16, %v780_v9  ;;  %v805_v18 = vpack.c.bf16 %v3405_v16, %v803_v10  ;;  %vm2077_vm3 = vcmp.lt.s32.totalorder %v2076_v60, 81  ;;  %v1961_v19 = vunpack.c.h.bf16 %v3255_v5  ;;  %v3245_v10 = vld [vmem:[%s3959_s4 + $0x18] sm:$0xff]  }
  0x3d   : > { %v1378_v20 = vsel %vm274_vm0, %v1372_v11, %v3448_v2  ;;  %v1401_v21 = vsel %vm274_vm0, %v1395_v12, %v3448_v2  ;;  %v2143_v22 = vrot.slane %v2142_v63, 7  ;;  %v2169_v23 = vrot.slane %v2168_v0, 7 }
  0x3e   : > { %785 = vst [vmem:[#allocation17 + $0x58] sm:$0xf] %v782_v17  ;;  %808 = vst [vmem:[#allocation17 + $0x5c] sm:$0xf] %v805_v18  ;;  %v1380_v25 = vpack.c.bf16 %v3405_v16, %v1378_v20  ;;  %v1403_v26 = vpack.c.bf16 %v3405_v16, %v1401_v21  ;;  %v2060_v29 = vrot.slane %v2059_v13, 7  ;;  %v2109_v31 = vrot.slane %v2108_v14, 7 }
  0x3f   : > { %v1920_v32 = vunpack.c.l.bf16 %v3255_v5  ;;  %v1889_v33 = vunpack.c.h.bf16 %v3253_v15  ;;  %v2078_v35 = vsel %vm2077_vm3, %v2072_v59, %v3450_v3  ;;  %v2127_v36 = vsel %vm2077_vm3, %v2121_v57, %v3450_v3  ;;  %v3247_v59 = vld [vmem:[%s3959_s4 + $0x20] sm:$0xff]  }
  0x40   : > { %1383 = vst [vmem:[#allocation17 + $0xc0] sm:$0xf] %v1380_v25  ;;  %1406 = vst [vmem:[#allocation17 + $0xc4] sm:$0xf] %v1403_v26  ;;  %v1848_v38 = vunpack.c.l.bf16 %v3253_v15  ;;  %v1817_v39 = vunpack.c.h.bf16 %v3727_v24  ;;  %v820_v40 = vunpack.c.l.bf16 %v3212_v37  ;;  %v843_v41 = vunpack.c.h.bf16 %v3212_v37  ;;  %v3241_v37 = vld [vmem:[%s3959_s4 + $0x8] sm:$0xff]  }
  0x41   : > { %v2155_v42 = vmax.f32 %v3450_v3, %v2143_v22  ;;  %v2172_v43 = vmax.f32 %v3450_v3, %v2169_v23  ;;  %v2090_v46 = vmax.f32 %v2078_v35, %v2060_v29  ;;  %v2130_v47 = vmax.f32 %v2127_v36, %v2109_v31 }
  0x42   : > { %v826_v48 = vsel %vm274_vm0, %v820_v40, %v3448_v2  ;;  %v849_v49 = vsel %vm274_vm0, %v843_v41, %v3448_v2  ;;  %v2042_v55 = vmax.f32 %v2033_v1, %v3450_v3  ;;  %v2010_v56 = vmax.f32 %v1992_v4, %v3450_v3 }
  0x43   : > { %v828_v53 = vpack.c.bf16 %v3405_v16, %v826_v48  ;;  %v851_v54 = vpack.c.bf16 %v3405_v16, %v849_v49  ;;  %v1970_v57 = vmax.f32 %v1961_v19, %v3450_v3  ;;  %v1938_v7 = vmax.f32 %v1920_v32, %v3450_v3  ;;  %v3243_v19 = vld [vmem:[%s3959_s4 + $0x10] sm:$0xff]   ;;  %v3239_v48 = vld [vmem:[%s3959_s4] sm:$0xff]  }
  0x44   : > { %v3759_v58 = vmax.f32 %v1889_v33, %v3450_v3  ;;  %v3765_v62 = vmax.f32 %v1848_v38, %v3450_v3  ;;  %v3768_v63 = vmax.f32 %v1817_v39, %v3450_v3  ;;  %v1776_v0 = vunpack.c.l.bf16 %v3727_v24 }
  0x45   : > { %831 = vst [vmem:[#allocation17 + $0x60] sm:$0xf] %v828_v53  ;;  %854 = vst [vmem:[#allocation17 + $0x64] sm:$0xf] %v851_v54  ;;  %v1745_v1 = vunpack.c.h.bf16 %v3249_v52  ;;  %v1704_v12 = vunpack.c.l.bf16 %v3249_v52  ;;  %v1673_v13 = vunpack.c.h.bf16 %v3247_v59  ;;  %v1641_v24 = vunpack.c.l.bf16 %v3247_v59 }
  0x46   : > { %v1794_v22 = vmax.f32 %v1776_v0, %v3450_v3  ;;  %v1619_v25 = vunpack.c.h.bf16 %v3245_v10  ;;  %v1587_v32 = vunpack.c.l.bf16 %v3245_v10  ;;  %v1565_v33 = vunpack.c.h.bf16 %v3243_v19 }
  0x47   : > { %v1754_v31 = vmax.f32 %v1745_v1, %v3450_v3  ;;  %v1722_v40 = vmax.f32 %v1704_v12, %v3450_v3  ;;  %v1682_v41 = vmax.f32 %v1673_v13, %v3450_v3  ;;  %v1511_v52 = vunpack.c.h.bf16 %v3241_v37 }
  0x48   : > { %v1628_v49 = vmax.f32 %v1619_v25, %v3450_v3 }
  0x82   : > { %v2263_v27 = vpop.permute.xlu0 %2262  ;;  %v2191_v28 = vpop.permute.xlu1 %2190 }
  0x83   : > { %v2270_v6 = vmax.f32 %v3450_v3, %v2263_v27  ;;  %v2198_v34 = vmax.f32 %v3450_v3, %v2191_v28 }
  0x86   : > { %v2299_v44 = vpop.permute.xlu0 %2298  ;;  %v2227_v45 = vpop.permute.xlu1 %2226 }
  0x87   : > { %v2306_v50 = vmax.f32 %v3450_v3, %v2299_v44  ;;  %v2234_v51 = vmax.f32 %v3450_v3, %v2227_v45 }
  0x89   : > { %v3393_v11 = vpack.c.bf16 %v2306_v50, %v2270_v6  ;;  %v3395_v23 = vpack.c.bf16 %v2234_v51, %v2198_v34  ;;  %v1605_v50 = vmax.f32 %v1587_v32, %v3450_v3  ;;  %v1574_v51 = vmax.f32 %v1565_v33, %v3450_v3 }
  0x8a   : > { %v2152_v60 = vpop.permute.xlu1 %2151  ;;  %v2087_v61 = vpop.permute.xlu0 %2086 }
  0x8b   : > { %v2159_v4 = vmax.f32 %v2155_v42, %v2152_v60  ;;  %v2176_v5 = vmax.f32 %v2172_v43, %v2152_v60  ;;  %v2094_v8 = vmax.f32 %v2090_v46, %v2087_v61  ;;  %v2134_v9 = vmax.f32 %v2130_v47, %v2087_v61  ;;  %2624 = vmatprep.subr.bf16.mxu0 %v3393_v11 }
  0x8c   : > { %3324 = vmatprep.subr.bf16.mxu1 %v3393_v11  ;;  %2625 = vmatpush1.bf16.msra.mxu0 %v3393_v11  ;;  %v1659_v42 = vmax.f32 %v1641_v24, %v3450_v3  ;;  %v1533_v43 = vunpack.c.l.bf16 %v3243_v19  ;;  %v1479_v60 = vunpack.c.l.bf16 %v3241_v37  ;;  %v1457_v61 = vunpack.c.h.bf16 %v3239_v48 }
  0x8d   : > { %v2162_v14 = vpack.c.bf16 %v3405_v16, %v2159_v4  ;;  %v2179_v15 = vpack.c.bf16 %v3405_v16, %v2176_v5  ;;  %v2097_v17 = vpack.c.bf16 %v3405_v16, %v2094_v8  ;;  %v2137_v18 = vpack.c.bf16 %v3405_v16, %v2134_v9  ;;  %3332 = vmatpush1.bf16.msra.mxu1 %v3393_v11 }
  0x8e   : > { %v2007_v20 = vpop.permute.xlu1 %2006  ;;  %v1935_v21 = vpop.permute.xlu0 %1934  ;;  %2626 = vmatprep.subr.bf16.mxu0 %v3395_v23  ;;  %3325 = vmatprep.subr.bf16.mxu1 %v3395_v23  ;;  %v1551_v59 = vmax.f32 %v1533_v43, %v3450_v3 }
  0x8f   : > { %2165 = vst [vmem:[#allocation18 + $0x58] sm:$0xf] %v2162_v14  ;;  %2182 = vst [vmem:[#allocation18 + $0x5c] sm:$0xf] %v2179_v15  ;;  %v2014_v26 = vmax.f32 %v2010_v56, %v2007_v20  ;;  %v2046_v27 = vmax.f32 %v2042_v55, %v2007_v20  ;;  %v1942_v28 = vmax.f32 %v1938_v7, %v1935_v21 }
  0x90   : > { %2100 = vst [vmem:[#allocation18 + $0x50] sm:$0xf] %v2097_v17  ;;  %2140 = vst [vmem:[#allocation18 + $0x54] sm:$0xf] %v2137_v18  ;;  %v1974_v29 = vmax.f32 %v1970_v57, %v1935_v21  ;;  %2627 = vmatpush1.bf16.msra.mxu0 %v3395_v23  ;;  %v1520_v15 = vmax.f32 %v1511_v52, %v3450_v3  ;;  %v1497_v17 = vmax.f32 %v1479_v60, %v3450_v3  ;;  %v3374_v52 = vld [vmem:[#allocation17 + $0x18] sm:$0xff]   ;;  %v3383_v60 = vld [vmem:[#allocation17 + $0xa0] sm:$0xff]  }
  0x91   : > { %v2017_v6 = vpack.c.bf16 %v3405_v16, %v2014_v26  ;;  %v2049_v34 = vpack.c.bf16 %v3405_v16, %v2046_v27  ;;  %v1945_v35 = vpack.c.bf16 %v3405_v16, %v1942_v28  ;;  %3333 = vmatpush1.bf16.msra.mxu1 %v3395_v23  ;;  %v1466_v18 = vmax.f32 %v1457_v61, %v3450_v3  ;;  %v3384_v61 = vld [vmem:[#allocation17 + $0x40] sm:$0xff]  }
  0x92   : > { %v1977_v36 = vpack.c.bf16 %v3405_v16, %v1974_v29  ;;  %v1863_v38 = vpop.permute.xlu1 %1862  ;;  %v1791_v39 = vpop.permute.xlu0 %1790 }
  0x93   : > { %2020 = vst [vmem:[#allocation18 + $0x48] sm:$0xf] %v2017_v6  ;;  %2052 = vst [vmem:[#allocation18 + $0x4c] sm:$0xf] %v2049_v34  ;;  %v1870_v44 = vmax.f32 %v3765_v62, %v1863_v38  ;;  %v1902_v45 = vmax.f32 %v3759_v58, %v1863_v38  ;;  %v1798_v46 = vmax.f32 %v1794_v22, %v1791_v39  ;;  %v1417_v62 = vunpack.c.l.bf16 %v3239_v48  ;;  %v3370_v48 = vld [vmem:[#allocation17 + $0x8] sm:$0xff]  }
  0x94   : > { %1948 = vst [vmem:[#allocation18 + $0x40] sm:$0xf] %v1945_v35  ;;  %1980 = vst [vmem:[#allocation18 + $0x44] sm:$0xf] %v1977_v36  ;;  %v1830_v47 = vmax.f32 %v3768_v63, %v1791_v39 }
  0x95   : > { %v1873_v53 = vpack.c.bf16 %v3405_v16, %v1870_v44  ;;  %v1905_v54 = vpack.c.bf16 %v3405_v16, %v1902_v45  ;;  %v1801_v55 = vpack.c.bf16 %v3405_v16, %v1798_v46  ;;  %v1434_v19 = vmax.f32 %v1417_v62, %v3450_v3  ;;  %v3368_v46 = vld [vmem:[#allocation17] sm:$0xff]   ;;  %v3385_v62 = vld [vmem:[#allocation17 + $0xa8] sm:$0xff]  }
  0x96   : > { %v1833_v56 = vpack.c.bf16 %v3405_v16, %v1830_v47  ;;  %v1719_v57 = vpop.permute.xlu1 %1718  ;;  %v1656_v7 = vpop.permute.xlu0 %1655  ;;  %v3369_v47 = vld [vmem:[#allocation17 + $0x68] sm:$0xff]  }
  0x97   : > { %v3350_v58 = vld [vmem:[#allocation18 + $0x54] ss:$8 sps:$4 sm:$0xff]   ;;  %1876 = vst [vmem:[#allocation18 + $0x38] sm:$0xf] %v1873_v53  ;;  %1908 = vst [vmem:[#allocation18 + $0x3c] sm:$0xf] %v1905_v54  ;;  %v1726_v63 = vmax.f32 %v1722_v40, %v1719_v57  ;;  %v1758_v0 = vmax.f32 %v1754_v31, %v1719_v57  ;;  %v1663_v1 = vmax.f32 %v1659_v42, %v1656_v7 }
  0x98   : > { %1804 = vst [vmem:[#allocation18 + $0x30] sm:$0xf] %v1801_v55  ;;  %1836 = vst [vmem:[#allocation18 + $0x34] sm:$0xf] %v1833_v56  ;;  %v1686_v4 = vmax.f32 %v1682_v41, %v1656_v7  ;;  %v3352_v5 = vld [vmem:[#allocation18 + $0x50] ss:$8 sps:$4 sm:$0xff]   ;;  %2628 = vmatprep.subr.bf16.mxu0 %v3350_v58  ;;  %3326 = vmatprep.subr.bf16.mxu1 %v3350_v58 }
  0x99   : > { %v1729_v8 = vpack.c.bf16 %v3405_v16, %v1726_v63  ;;  %v1761_v9 = vpack.c.bf16 %v3405_v16, %v1758_v0  ;;  %v1666_v10 = vpack.c.bf16 %v3405_v16, %v1663_v1  ;;  %2629 = vmatpush1.bf16.msra.mxu0 %v3352_v5  ;;  %3334 = vmatpush1.bf16.msra.mxu1 %v3352_v5  ;;  %v3375_v53 = vld [vmem:[#allocation17 + $0x80] sm:$0xff]   ;;  %v3377_v55 = vld [vmem:[#allocation17 + $0x88] sm:$0xff]   ;;  %v3379_v57 = vld [vmem:[#allocation17 + $0x90] sm:$0xff]  }
  0x9a   : > { %v1689_v11 = vpack.c.bf16 %v3405_v16, %v1686_v4  ;;  %v1602_v12 = vpop.permute.xlu1 %1601  ;;  %v1548_v13 = vpop.permute.xlu0 %1547  ;;  %v3376_v54 = vld [vmem:[#allocation17 + $0x20] sm:$0xff]   ;;  %v3378_v56 = vld [vmem:[#allocation17 + $0x28] sm:$0xff]   ;;  %v3380_v7 = vld [vmem:[#allocation17 + $0x30] sm:$0xff]  }
  0x9b   : > { %v3353_v14 = vld [vmem:[#allocation18 + $0x44] ss:$8 sps:$4 sm:$0xff]   ;;  %1732 = vst [vmem:[#allocation18 + $0x28] sm:$0xf] %v1729_v8  ;;  %1764 = vst [vmem:[#allocation18 + $0x2c] sm:$0xf] %v1761_v9  ;;  %v1609_v20 = vmax.f32 %v1605_v50, %v1602_v12  ;;  %v1632_v21 = vmax.f32 %v1628_v49, %v1602_v12  ;;  %v1555_v22 = vmax.f32 %v1551_v59, %v1548_v13 }
  0x9c   : > { %1669 = vst [vmem:[#allocation18 + $0x20] sm:$0xf] %v1666_v10  ;;  %1692 = vst [vmem:[#allocation18 + $0x24] sm:$0xf] %v1689_v11  ;;  %v1578_v23 = vmax.f32 %v1574_v51, %v1548_v13  ;;  %v3355_v24 = vld [vmem:[#allocation18 + $0x40] ss:$8 sps:$4 sm:$0xff]   ;;  %2630 = vmatprep.subr.bf16.mxu0 %v3353_v14  ;;  %3327 = vmatprep.subr.bf16.mxu1 %v3353_v14 }
  0x9d   : > { %v1612_v25 = vpack.c.bf16 %v3405_v16, %v1609_v20  ;;  %v1635_v26 = vpack.c.bf16 %v3405_v16, %v1632_v21  ;;  %v1558_v27 = vpack.c.bf16 %v3405_v16, %v1555_v22  ;;  %2631 = vmatpush1.bf16.msra.mxu0 %v3355_v24  ;;  %3335 = vmatpush1.bf16.msra.mxu1 %v3355_v24  ;;  %v3371_v49 = vld [vmem:[#allocation17 + $0x70] sm:$0xff]   ;;  %v3373_v51 = vld [vmem:[#allocation17 + $0x78] sm:$0xff]   ;;  %v3386_v63 = vld [vmem:[#allocation17 + $0x48] sm:$0xff]  }
  0x9e   : > { %v1581_v28 = vpack.c.bf16 %v3405_v16, %v1578_v23  ;;  %v1494_v29 = vpop.permute.xlu1 %1493  ;;  %v1431_v31 = vpop.permute.xlu0 %1430  ;;  %v3372_v50 = vld [vmem:[#allocation17 + $0x10] sm:$0xff]   ;;  %v3381_v58 = vld [vmem:[#allocation17 + $0x98] sm:$0xff]   ;;  %v3391_v8 = vld [vmem:[#allocation17 + $0xc0] sm:$0xff]  }
  0x9f   : > { %v3356_v32 = vld [vmem:[#allocation18 + $0x34] ss:$8 sps:$4 sm:$0xff]   ;;  %1615 = vst [vmem:[#allocation18 + $0x18] sm:$0xf] %v1612_v25  ;;  %1638 = vst [vmem:[#allocation18 + $0x1c] sm:$0xf] %v1635_v26  ;;  %v1501_v33 = vmax.f32 %v1497_v17, %v1494_v29  ;;  %v1524_v6 = vmax.f32 %v1520_v15, %v1494_v29  ;;  %v1438_v34 = vmax.f32 %v1434_v19, %v1431_v31 }
  0xa0   : > { %1561 = vst [vmem:[#allocation18 + $0x10] sm:$0xf] %v1558_v27  ;;  %1584 = vst [vmem:[#allocation18 + $0x14] sm:$0xf] %v1581_v28  ;;  %v1470_v35 = vmax.f32 %v1466_v18, %v1431_v31  ;;  %v3358_v36 = vld [vmem:[#allocation18 + $0x30] ss:$8 sps:$4 sm:$0xff]   ;;  %2632 = vmatprep.subr.bf16.mxu0 %v3356_v32  ;;  %3328 = vmatprep.subr.bf16.mxu1 %v3356_v32 }
  0xa1   : > { %v1504_v37 = vpack.c.bf16 %v3405_v16, %v1501_v33  ;;  %v1527_v38 = vpack.c.bf16 %v3405_v16, %v1524_v6  ;;  %v1440_v39 = vpack.c.bf16 %v3405_v16, %v1438_v34  ;;  %2633 = vmatpush1.bf16.msra.mxu0 %v3358_v36  ;;  %3336 = vmatpush1.bf16.msra.mxu1 %v3358_v36  ;;  %v3382_v59 = vld [vmem:[#allocation17 + $0x38] sm:$0xff]   ;;  %v3387_v0 = vld [vmem:[#allocation17 + $0xb0] sm:$0xff]   ;;  %v3392_v9 = vld [vmem:[#allocation17 + $0x60] sm:$0xff]  }
  0xa2   : > { %v1473_v40 = vpack.c.bf16 %v3405_v16, %v1470_v35  ;;  %v3388_v1 = vld [vmem:[#allocation17 + $0x50] sm:$0xff]   ;;  %v3389_v4 = vld [vmem:[#allocation17 + $0xb8] sm:$0xff]  }
  0xa3   : > { %v3359_v41 = vld [vmem:[#allocation18 + $0x24] ss:$8 sps:$4 sm:$0xff]   ;;  %1507 = vst [vmem:[#allocation18 + $0x8] sm:$0xf] %v1504_v37  ;;  %1530 = vst [vmem:[#allocation18 + $0xc] sm:$0xf] %v1527_v38 }
  0xa4   : > { %1443 = vst [vmem:[#allocation18] sm:$0xf] %v1440_v39  ;;  %1476 = vst [vmem:[#allocation18 + $0x4] sm:$0xf] %v1473_v40  ;;  %v3361_v42 = vld [vmem:[#allocation18 + $0x20] ss:$8 sps:$4 sm:$0xff]   ;;  %2634 = vmatprep.subr.bf16.mxu0 %v3359_v41  ;;  %3329 = vmatprep.subr.bf16.mxu1 %v3359_v41 }
  0xa5   : > { %2635 = vmatpush1.bf16.msra.mxu0 %v3361_v42  ;;  %3337 = vmatpush1.bf16.msra.mxu1 %v3361_v42  ;;  %v3390_v5 = vld [vmem:[#allocation17 + $0x58] sm:$0xff]  }
  0xa7   : > { %v3362_v43 = vld [vmem:[#allocation18 + $0x14] ss:$8 sps:$4 sm:$0xff]   ;;  %v3364_v44 = vld [vmem:[#allocation18 + $0x10] ss:$8 sps:$4 sm:$0xff]  }
  0xa8   : > { %2636 = vmatprep.subr.bf16.mxu0 %v3362_v43  ;;  %3330 = vmatprep.subr.bf16.mxu1 %v3362_v43 }
  0xa9   : > { %2637 = vmatpush1.bf16.msra.mxu0 %v3364_v44  ;;  %3338 = vmatpush1.bf16.msra.mxu1 %v3364_v44 }
  0xab   : > { %v3365_v45 = vld [vmem:[#allocation18 + $0x4] ss:$8 sps:$4 sm:$0xff]   ;;  %v3367_v16 = vld [vmem:[#allocation18] ss:$8 sps:$4 sm:$0xff]  }
  0xac   : > { %2638 = vmatprep.subr.bf16.mxu0 %v3365_v45  ;;  %3331 = vmatprep.subr.bf16.mxu1 %v3365_v45 }
  0xad   : > { %2639 = vmatpush1.bf16.msra.mxu0 %v3367_v16  ;;  %3339 = vmatpush1.bf16.msra.mxu1 %v3367_v16 }
  0xb0   : > { %2657 = vmatmul.mubr.bf16.vlgmr.msra.gmra.mxu0 %v3368_v46  ;;  %2787 = vmatmul.mubr.bf16.vlgmr.msra.gmra.mxu1 %v3369_v47 }
  0xb1   : > { %2666 = vmatprep.mubr.bf16.mxu0 %v3406_v30  ;;  %2796 = vmatprep.mubr.bf16.mxu1 %v3406_v30 }
  0xb8   : > { %2667 = vmatmul.mubr.bf16.gmra.mxu0 %v3370_v48  ;;  %2797 = vmatmul.mubr.bf16.gmra.mxu1 %v3371_v49 }
  0xb9   : > { %2676 = vmatprep.mubr.bf16.mxu0 %v3406_v30  ;;  %2806 = vmatprep.mubr.bf16.mxu1 %v3406_v30 }
  0xc0   : > { %2677 = vmatmul.mubr.bf16.gmra.mxu0 %v3372_v50  ;;  %2807 = vmatmul.mubr.bf16.gmra.mxu1 %v3373_v51 }
  0xc1   : > { %2686 = vmatprep.mubr.bf16.mxu0 %v3406_v30  ;;  %2816 = vmatprep.mubr.bf16.mxu1 %v3406_v30 }
  0xc8   : > { %2687 = vmatmul.mubr.bf16.gmra.mxu0 %v3374_v52  ;;  %2817 = vmatmul.mubr.bf16.gmra.mxu1 %v3375_v53 }
  0xc9   : > { %2696 = vmatprep.mubr.bf16.mxu0 %v3406_v30  ;;  %2826 = vmatprep.mubr.bf16.mxu1 %v3406_v30 }
  0xd0   : > { %2697 = vmatmul.mubr.bf16.gmra.mxu0 %v3376_v54  ;;  %2827 = vmatmul.mubr.bf16.gmra.mxu1 %v3377_v55 }
  0xd1   : > { %2706 = vmatprep.mubr.bf16.mxu0 %v3406_v30  ;;  %2836 = vmatprep.mubr.bf16.mxu1 %v3406_v30 }
  0xd8   : > { %2707 = vmatmul.mubr.bf16.gmra.mxu0 %v3378_v56  ;;  %2837 = vmatmul.mubr.bf16.gmra.mxu1 %v3379_v57 }
  0xd9   : > { %2716 = vmatprep.mubr.bf16.mxu0 %v3406_v30  ;;  %2846 = vmatprep.mubr.bf16.mxu1 %v3406_v30 }
  0xe0   : > { %2717 = vmatmul.mubr.bf16.gmra.mxu0 %v3380_v7  ;;  %2847 = vmatmul.mubr.bf16.gmra.mxu1 %v3381_v58 }
  0xe1   : > { %2726 = vmatprep.mubr.bf16.mxu0 %v3406_v30  ;;  %2856 = vmatprep.mubr.bf16.mxu1 %v3406_v30 }
  0xe8   : > { %2727 = vmatmul.mubr.bf16.gmra.mxu0 %v3382_v59  ;;  %2857 = vmatmul.mubr.bf16.gmra.mxu1 %v3383_v60 }
  0xe9   : > { %2736 = vmatprep.mubr.bf16.mxu0 %v3406_v30  ;;  %2866 = vmatprep.mubr.bf16.mxu1 %v3406_v30 }
  0xf0   : > { %2737 = vmatmul.mubr.bf16.gmra.mxu0 %v3384_v61  ;;  %2867 = vmatmul.mubr.bf16.gmra.mxu1 %v3385_v62 }
  0xf1   : > { %2746 = vmatprep.mubr.bf16.mxu0 %v3406_v30  ;;  %2876 = vmatprep.mubr.bf16.mxu1 %v3406_v30 }
  0xf8   : > { %2747 = vmatmul.mubr.bf16.gmra.mxu0 %v3386_v63  ;;  %2877 = vmatmul.mubr.bf16.gmra.mxu1 %v3387_v0 }
  0xf9   : > { %2756 = vmatprep.mubr.bf16.mxu0 %v3406_v30  ;;  %2886 = vmatprep.mubr.bf16.mxu1 %v3406_v30 }
 0x100   : > { %2757 = vmatmul.mubr.bf16.gmra.mxu0 %v3388_v1  ;;  %2887 = vmatmul.mubr.bf16.gmra.mxu1 %v3389_v4 }
 0x101   : > { %2766 = vmatprep.mubr.bf16.mxu0 %v3406_v30  ;;  %2896 = vmatprep.mubr.bf16.mxu1 %v3406_v30 }
 0x108   : > { %2767 = vmatmul.mubr.bf16.gmra.mxu0 %v3390_v5  ;;  %2897 = vmatmul.mubr.bf16.gmra.mxu1 %v3391_v8 }
 0x109   : > { %2776 = vmatprep.mubr.bf16.mxu0 %v3406_v30 }
 0x110   : > { %2777 = vmatmul.mubr.bf16.gmra.mxu0 %v3392_v9 }
 0x170   : > { %v2658_v10 = vpop.f32.mrf.mxu0  ;;  %v2788_v12 = vpop.f32.mrf.mxu1 }
 0x171   : > { %v2907_v11 = vmax.f32 %v2658_v10, 0.0  ;;  %v2959_v14 = vmax.f32 %v2788_v12, 0.0 }
 0x172   : > { %v2660_v13 = vpop.f32.mrf.mxu0  ;;  %v2790_v15 = vpop.f32.mrf.mxu1 }
 0x173   : > { %3007 = vst [vmem:[%s3850_s13] sm:$0xff] %v2907_v11  ;;  %v2908_v30 = vmax.f32 %v2660_v13, 0.0  ;;  %3059 = vst [vmem:[%s3850_s13 + $0x1a0] sm:$0xff] %v2959_v14  ;;  %v2960_v18 = vmax.f32 %v2790_v15, 0.0 }
 0x174   : > { %v2662_v17 = vpop.f32.mrf.mxu0  ;;  %v2792_v20 = vpop.f32.mrf.mxu1 }
 0x175   : > { %3008 = vst [vmem:[%s3850_s13 + $0x8] sm:$0xff] %v2908_v30  ;;  %v2909_v19 = vmax.f32 %v2662_v17, 0.0  ;;  %3060 = vst [vmem:[%s3850_s13 + $0x1a8] sm:$0xff] %v2960_v18  ;;  %v2961_v22 = vmax.f32 %v2792_v20, 0.0 }
 0x176   : > { %v2664_v21 = vpop.f32.mrf.mxu0  ;;  %v2794_v24 = vpop.f32.mrf.mxu1 }
 0x177   : > { %3009 = vst [vmem:[%s3850_s13 + $0x10] sm:$0xff] %v2909_v19  ;;  %v2910_v23 = vmax.f32 %v2664_v21, 0.0  ;;  %3061 = vst [vmem:[%s3850_s13 + $0x1b0] sm:$0xff] %v2961_v22  ;;  %v2962_v26 = vmax.f32 %v2794_v24, 0.0 }
 0x178   : > { %v2668_v25 = vpop.f32.mrf.mxu0  ;;  %v2798_v28 = vpop.f32.mrf.mxu1 }
 0x179   : > { %3010 = vst [vmem:[%s3850_s13 + $0x18] sm:$0xff] %v2910_v23  ;;  %v2911_v27 = vmax.f32 %v2668_v25, 0.0  ;;  %3062 = vst [vmem:[%s3850_s13 + $0x1b8] sm:$0xff] %v2962_v26  ;;  %v2963_v31 = vmax.f32 %v2798_v28, 0.0 }
 0x17a   : > { %v2670_v29 = vpop.f32.mrf.mxu0  ;;  %v2800_v33 = vpop.f32.mrf.mxu1 }
 0x17b   : > { %3011 = vst [vmem:[%s3850_s13 + $0x20] sm:$0xff] %v2911_v27  ;;  %v2912_v32 = vmax.f32 %v2670_v29, 0.0  ;;  %3063 = vst [vmem:[%s3850_s13 + $0x1c0] sm:$0xff] %v2963_v31  ;;  %v2964_v34 = vmax.f32 %v2800_v33, 0.0 }
 0x17c   : > { %v2672_v6 = vpop.f32.mrf.mxu0  ;;  %v2802_v36 = vpop.f32.mrf.mxu1 }
 0x17d   : > { %3012 = vst [vmem:[%s3850_s13 + $0x28] sm:$0xff] %v2912_v32  ;;  %v2913_v35 = vmax.f32 %v2672_v6, 0.0  ;;  %3064 = vst [vmem:[%s3850_s13 + $0x1c8] sm:$0xff] %v2964_v34  ;;  %v2965_v38 = vmax.f32 %v2802_v36, 0.0 }
 0x17e   : > { %v2674_v37 = vpop.f32.mrf.mxu0  ;;  %v2804_v40 = vpop.f32.mrf.mxu1 }
 0x17f   : > { %3013 = vst [vmem:[%s3850_s13 + $0x30] sm:$0xff] %v2913_v35  ;;  %v2914_v39 = vmax.f32 %v2674_v37, 0.0  ;;  %3065 = vst [vmem:[%s3850_s13 + $0x1d0] sm:$0xff] %v2965_v38  ;;  %v2966_v42 = vmax.f32 %v2804_v40, 0.0 }
 0x180   : > { %v2678_v41 = vpop.f32.mrf.mxu0  ;;  %v2808_v44 = vpop.f32.mrf.mxu1 }
 0x181   : > { %3014 = vst [vmem:[%s3850_s13 + $0x38] sm:$0xff] %v2914_v39  ;;  %v2915_v43 = vmax.f32 %v2678_v41, 0.0  ;;  %3066 = vst [vmem:[%s3850_s13 + $0x1d8] sm:$0xff] %v2966_v42  ;;  %v2967_v16 = vmax.f32 %v2808_v44, 0.0 }
 0x182   : > { %v2680_v45 = vpop.f32.mrf.mxu0  ;;  %v2810_v47 = vpop.f32.mrf.mxu1 }
 0x183   : > { %3015 = vst [vmem:[%s3850_s13 + $0x40] sm:$0xff] %v2915_v43  ;;  %v2916_v46 = vmax.f32 %v2680_v45, 0.0  ;;  %3067 = vst [vmem:[%s3850_s13 + $0x1e0] sm:$0xff] %v2967_v16  ;;  %v2968_v49 = vmax.f32 %v2810_v47, 0.0 }
 0x184   : > { %v2682_v48 = vpop.f32.mrf.mxu0  ;;  %v2812_v51 = vpop.f32.mrf.mxu1 }
 0x185   : > { %3016 = vst [vmem:[%s3850_s13 + $0x48] sm:$0xff] %v2916_v46  ;;  %v2917_v50 = vmax.f32 %v2682_v48, 0.0  ;;  %3068 = vst [vmem:[%s3850_s13 + $0x1e8] sm:$0xff] %v2968_v49  ;;  %v2969_v53 = vmax.f32 %v2812_v51, 0.0 }
 0x186   : > { %v2684_v52 = vpop.f32.mrf.mxu0  ;;  %v2814_v55 = vpop.f32.mrf.mxu1 }
 0x187   : > { %3017 = vst [vmem:[%s3850_s13 + $0x50] sm:$0xff] %v2917_v50  ;;  %v2918_v54 = vmax.f32 %v2684_v52, 0.0  ;;  %3069 = vst [vmem:[%s3850_s13 + $0x1f0] sm:$0xff] %v2969_v53  ;;  %v2970_v57 = vmax.f32 %v2814_v55, 0.0 }
 0x188   : > { %v2688_v56 = vpop.f32.mrf.mxu0  ;;  %v2818_v58 = vpop.f32.mrf.mxu1 }
 0x189   : > { %3018 = vst [vmem:[%s3850_s13 + $0x58] sm:$0xff] %v2918_v54  ;;  %v2919_v7 = vmax.f32 %v2688_v56, 0.0  ;;  %3070 = vst [vmem:[%s3850_s13 + $0x1f8] sm:$0xff] %v2970_v57  ;;  %v2971_v60 = vmax.f32 %v2818_v58, 0.0 }
 0x18a   : > { %v2690_v59 = vpop.f32.mrf.mxu0  ;;  %v2820_v62 = vpop.f32.mrf.mxu1 }
 0x18b   : > { %3019 = vst [vmem:[%s3850_s13 + $0x60] sm:$0xff] %v2919_v7  ;;  %v2920_v61 = vmax.f32 %v2690_v59, 0.0  ;;  %3071 = vst [vmem:[%s3850_s13 + $0x200] sm:$0xff] %v2971_v60  ;;  %v2972_v0 = vmax.f32 %v2820_v62, 0.0 }
 0x18c   : > { %v2692_v63 = vpop.f32.mrf.mxu0  ;;  %v2822_v4 = vpop.f32.mrf.mxu1 }
 0x18d   : > { %3020 = vst [vmem:[%s3850_s13 + $0x68] sm:$0xff] %v2920_v61  ;;  %v2921_v1 = vmax.f32 %v2692_v63, 0.0  ;;  %3072 = vst [vmem:[%s3850_s13 + $0x208] sm:$0xff] %v2972_v0  ;;  %v2973_v8 = vmax.f32 %v2822_v4, 0.0 }
 0x18e   : > { %v2694_v5 = vpop.f32.mrf.mxu0  ;;  %v2824_v10 = vpop.f32.mrf.mxu1 }
 0x18f   : > { %3021 = vst [vmem:[%s3850_s13 + $0x70] sm:$0xff] %v2921_v1  ;;  %v2922_v9 = vmax.f32 %v2694_v5, 0.0  ;;  %3073 = vst [vmem:[%s3850_s13 + $0x210] sm:$0xff] %v2973_v8  ;;  %v2974_v12 = vmax.f32 %v2824_v10, 0.0 }
 0x190   : > { %v2698_v11 = vpop.f32.mrf.mxu0  ;;  %v2828_v14 = vpop.f32.mrf.mxu1 }
 0x191   : > { %3022 = vst [vmem:[%s3850_s13 + $0x78] sm:$0xff] %v2922_v9  ;;  %v2923_v13 = vmax.f32 %v2698_v11, 0.0  ;;  %3074 = vst [vmem:[%s3850_s13 + $0x218] sm:$0xff] %v2974_v12  ;;  %v2975_v15 = vmax.f32 %v2828_v14, 0.0 }
 0x192   : > { %v2700_v30 = vpop.f32.mrf.mxu0  ;;  %v2830_v18 = vpop.f32.mrf.mxu1 }
 0x193   : > { %3023 = vst [vmem:[%s3850_s13 + $0x80] sm:$0xff] %v2923_v13  ;;  %v2924_v17 = vmax.f32 %v2700_v30, 0.0  ;;  %3075 = vst [vmem:[%s3850_s13 + $0x220] sm:$0xff] %v2975_v15  ;;  %v2976_v20 = vmax.f32 %v2830_v18, 0.0 }
 0x194   : > { %v2702_v19 = vpop.f32.mrf.mxu0  ;;  %v2832_v22 = vpop.f32.mrf.mxu1 }
 0x195   : > { %3024 = vst [vmem:[%s3850_s13 + $0x88] sm:$0xff] %v2924_v17  ;;  %v2925_v21 = vmax.f32 %v2702_v19, 0.0  ;;  %3076 = vst [vmem:[%s3850_s13 + $0x228] sm:$0xff] %v2976_v20  ;;  %v2977_v24 = vmax.f32 %v2832_v22, 0.0 }
 0x196   : > { %v2704_v23 = vpop.f32.mrf.mxu0  ;;  %v2834_v26 = vpop.f32.mrf.mxu1 }
 0x197   : > { %3025 = vst [vmem:[%s3850_s13 + $0x90] sm:$0xff] %v2925_v21  ;;  %v2926_v25 = vmax.f32 %v2704_v23, 0.0  ;;  %3077 = vst [vmem:[%s3850_s13 + $0x230] sm:$0xff] %v2977_v24  ;;  %v2978_v28 = vmax.f32 %v2834_v26, 0.0 }
 0x198   : > { %v2708_v27 = vpop.f32.mrf.mxu0  ;;  %v2838_v31 = vpop.f32.mrf.mxu1 }
 0x199   : > { %3026 = vst [vmem:[%s3850_s13 + $0x98] sm:$0xff] %v2926_v25  ;;  %v2927_v29 = vmax.f32 %v2708_v27, 0.0  ;;  %3078 = vst [vmem:[%s3850_s13 + $0x238] sm:$0xff] %v2978_v28  ;;  %v2979_v33 = vmax.f32 %v2838_v31, 0.0 }
 0x19a   : > { %v2710_v32 = vpop.f32.mrf.mxu0  ;;  %v2840_v34 = vpop.f32.mrf.mxu1 }
 0x19b   : > { %3027 = vst [vmem:[%s3850_s13 + $0xa0] sm:$0xff] %v2927_v29  ;;  %v2928_v6 = vmax.f32 %v2710_v32, 0.0  ;;  %3079 = vst [vmem:[%s3850_s13 + $0x240] sm:$0xff] %v2979_v33  ;;  %v2980_v36 = vmax.f32 %v2840_v34, 0.0 }
 0x19c   : > { %v2712_v35 = vpop.f32.mrf.mxu0  ;;  %v2842_v38 = vpop.f32.mrf.mxu1 }
 0x19d   : > { %3028 = vst [vmem:[%s3850_s13 + $0xa8] sm:$0xff] %v2928_v6  ;;  %v2929_v37 = vmax.f32 %v2712_v35, 0.0  ;;  %3080 = vst [vmem:[%s3850_s13 + $0x248] sm:$0xff] %v2980_v36  ;;  %v2981_v40 = vmax.f32 %v2842_v38, 0.0 }
 0x19e   : > { %v2714_v39 = vpop.f32.mrf.mxu0  ;;  %v2844_v42 = vpop.f32.mrf.mxu1 }
 0x19f   : > { %3029 = vst [vmem:[%s3850_s13 + $0xb0] sm:$0xff] %v2929_v37  ;;  %v2930_v41 = vmax.f32 %v2714_v39, 0.0  ;;  %3081 = vst [vmem:[%s3850_s13 + $0x250] sm:$0xff] %v2981_v40  ;;  %v2982_v44 = vmax.f32 %v2844_v42, 0.0 }
 0x1a0   : > { %v2718_v43 = vpop.f32.mrf.mxu0  ;;  %v2848_v16 = vpop.f32.mrf.mxu1 }
 0x1a1   : > { %3030 = vst [vmem:[%s3850_s13 + $0xb8] sm:$0xff] %v2930_v41  ;;  %v2931_v45 = vmax.f32 %v2718_v43, 0.0  ;;  %3082 = vst [vmem:[%s3850_s13 + $0x258] sm:$0xff] %v2982_v44  ;;  %v2983_v47 = vmax.f32 %v2848_v16, 0.0 }
 0x1a2   : > { %v2720_v46 = vpop.f32.mrf.mxu0  ;;  %v2850_v49 = vpop.f32.mrf.mxu1 }
 0x1a3   : > { %3031 = vst [vmem:[%s3850_s13 + $0xc0] sm:$0xff] %v2931_v45  ;;  %v2932_v48 = vmax.f32 %v2720_v46, 0.0  ;;  %3083 = vst [vmem:[%s3850_s13 + $0x260] sm:$0xff] %v2983_v47  ;;  %v2984_v51 = vmax.f32 %v2850_v49, 0.0 }
 0x1a4   : > { %v2722_v50 = vpop.f32.mrf.mxu0  ;;  %v2852_v53 = vpop.f32.mrf.mxu1 }
 0x1a5   : > { %3032 = vst [vmem:[%s3850_s13 + $0xc8] sm:$0xff] %v2932_v48  ;;  %v2933_v52 = vmax.f32 %v2722_v50, 0.0  ;;  %3084 = vst [vmem:[%s3850_s13 + $0x268] sm:$0xff] %v2984_v51  ;;  %v2985_v55 = vmax.f32 %v2852_v53, 0.0 }
 0x1a6   : > { %v2724_v54 = vpop.f32.mrf.mxu0  ;;  %v2854_v57 = vpop.f32.mrf.mxu1 }
 0x1a7   : > { %3033 = vst [vmem:[%s3850_s13 + $0xd0] sm:$0xff] %v2933_v52  ;;  %v2934_v56 = vmax.f32 %v2724_v54, 0.0  ;;  %3085 = vst [vmem:[%s3850_s13 + $0x270] sm:$0xff] %v2985_v55  ;;  %v2986_v58 = vmax.f32 %v2854_v57, 0.0 }
 0x1a8   : > { %v2728_v7 = vpop.f32.mrf.mxu0  ;;  %v2858_v60 = vpop.f32.mrf.mxu1 }
 0x1a9   : > { %3034 = vst [vmem:[%s3850_s13 + $0xd8] sm:$0xff] %v2934_v56  ;;  %v2935_v59 = vmax.f32 %v2728_v7, 0.0  ;;  %3086 = vst [vmem:[%s3850_s13 + $0x278] sm:$0xff] %v2986_v58  ;;  %v2987_v62 = vmax.f32 %v2858_v60, 0.0 }
 0x1aa   : > { %v2730_v61 = vpop.f32.mrf.mxu0  ;;  %v2860_v0 = vpop.f32.mrf.mxu1 }
 0x1ab   : > { %3035 = vst [vmem:[%s3850_s13 + $0xe0] sm:$0xff] %v2935_v59  ;;  %v2936_v63 = vmax.f32 %v2730_v61, 0.0  ;;  %3087 = vst [vmem:[%s3850_s13 + $0x280] sm:$0xff] %v2987_v62  ;;  %v2988_v4 = vmax.f32 %v2860_v0, 0.0 }
 0x1ac   : > { %v2732_v1 = vpop.f32.mrf.mxu0  ;;  %v2862_v8 = vpop.f32.mrf.mxu1 }
 0x1ad   : > { %3036 = vst [vmem:[%s3850_s13 + $0xe8] sm:$0xff] %v2936_v63  ;;  %v2937_v5 = vmax.f32 %v2732_v1, 0.0  ;;  %3088 = vst [vmem:[%s3850_s13 + $0x288] sm:$0xff] %v2988_v4  ;;  %v2989_v10 = vmax.f32 %v2862_v8, 0.0 }
 0x1ae   : > { %v2734_v9 = vpop.f32.mrf.mxu0  ;;  %v2864_v12 = vpop.f32.mrf.mxu1 }
 0x1af   : > { %3037 = vst [vmem:[%s3850_s13 + $0xf0] sm:$0xff] %v2937_v5  ;;  %v2938_v11 = vmax.f32 %v2734_v9, 0.0  ;;  %3089 = vst [vmem:[%s3850_s13 + $0x290] sm:$0xff] %v2989_v10  ;;  %v2990_v14 = vmax.f32 %v2864_v12, 0.0 }
 0x1b0   : > { %v2738_v13 = vpop.f32.mrf.mxu0  ;;  %v2868_v15 = vpop.f32.mrf.mxu1 }
 0x1b1   : > { %3038 = vst [vmem:[%s3850_s13 + $0xf8] sm:$0xff] %v2938_v11  ;;  %v2939_v30 = vmax.f32 %v2738_v13, 0.0  ;;  %3090 = vst [vmem:[%s3850_s13 + $0x298] sm:$0xff] %v2990_v14  ;;  %v2991_v18 = vmax.f32 %v2868_v15, 0.0 }
 0x1b2   : > { %v2740_v17 = vpop.f32.mrf.mxu0  ;;  %v2870_v20 = vpop.f32.mrf.mxu1 }
 0x1b3   : > { %3039 = vst [vmem:[%s3850_s13 + $0x100] sm:$0xff] %v2939_v30  ;;  %v2940_v19 = vmax.f32 %v2740_v17, 0.0  ;;  %3091 = vst [vmem:[%s3850_s13 + $0x2a0] sm:$0xff] %v2991_v18  ;;  %v2992_v22 = vmax.f32 %v2870_v20, 0.0 }
 0x1b4   : > { %v2742_v21 = vpop.f32.mrf.mxu0  ;;  %v2872_v24 = vpop.f32.mrf.mxu1 }
 0x1b5   : > { %3040 = vst [vmem:[%s3850_s13 + $0x108] sm:$0xff] %v2940_v19  ;;  %v2941_v23 = vmax.f32 %v2742_v21, 0.0  ;;  %3092 = vst [vmem:[%s3850_s13 + $0x2a8] sm:$0xff] %v2992_v22  ;;  %v2993_v26 = vmax.f32 %v2872_v24, 0.0 }
 0x1b6   : > { %v2744_v25 = vpop.f32.mrf.mxu0  ;;  %v2874_v28 = vpop.f32.mrf.mxu1 }
 0x1b7   : > { %3041 = vst [vmem:[%s3850_s13 + $0x110] sm:$0xff] %v2941_v23  ;;  %v2942_v27 = vmax.f32 %v2744_v25, 0.0  ;;  %3093 = vst [vmem:[%s3850_s13 + $0x2b0] sm:$0xff] %v2993_v26  ;;  %v2994_v31 = vmax.f32 %v2874_v28, 0.0 }
 0x1b8   : > { %v2748_v29 = vpop.f32.mrf.mxu0  ;;  %v2878_v33 = vpop.f32.mrf.mxu1 }
 0x1b9   : > { %3042 = vst [vmem:[%s3850_s13 + $0x118] sm:$0xff] %v2942_v27  ;;  %v2943_v32 = vmax.f32 %v2748_v29, 0.0  ;;  %3094 = vst [vmem:[%s3850_s13 + $0x2b8] sm:$0xff] %v2994_v31  ;;  %v2995_v34 = vmax.f32 %v2878_v33, 0.0 }
 0x1ba   : > { %v2750_v6 = vpop.f32.mrf.mxu0  ;;  %v2880_v36 = vpop.f32.mrf.mxu1 }
 0x1bb   : > { %3043 = vst [vmem:[%s3850_s13 + $0x120] sm:$0xff] %v2943_v32  ;;  %v2944_v35 = vmax.f32 %v2750_v6, 0.0  ;;  %3095 = vst [vmem:[%s3850_s13 + $0x2c0] sm:$0xff] %v2995_v34  ;;  %v2996_v38 = vmax.f32 %v2880_v36, 0.0 }
 0x1bc   : > { %v2752_v37 = vpop.f32.mrf.mxu0  ;;  %v2882_v40 = vpop.f32.mrf.mxu1 }
 0x1bd   : > { %3044 = vst [vmem:[%s3850_s13 + $0x128] sm:$0xff] %v2944_v35  ;;  %v2945_v39 = vmax.f32 %v2752_v37, 0.0  ;;  %3096 = vst [vmem:[%s3850_s13 + $0x2c8] sm:$0xff] %v2996_v38  ;;  %v2997_v42 = vmax.f32 %v2882_v40, 0.0 }
 0x1be   : > { %v2754_v41 = vpop.f32.mrf.mxu0  ;;  %v2884_v44 = vpop.f32.mrf.mxu1 }
 0x1bf   : > { %3045 = vst [vmem:[%s3850_s13 + $0x130] sm:$0xff] %v2945_v39  ;;  %v2946_v43 = vmax.f32 %v2754_v41, 0.0  ;;  %3097 = vst [vmem:[%s3850_s13 + $0x2d0] sm:$0xff] %v2997_v42  ;;  %v2998_v16 = vmax.f32 %v2884_v44, 0.0 }
 0x1c0   : > { %v2758_v45 = vpop.f32.mrf.mxu0  ;;  %v2888_v47 = vpop.f32.mrf.mxu1 }
 0x1c1   : > { %3046 = vst [vmem:[%s3850_s13 + $0x138] sm:$0xff] %v2946_v43  ;;  %v2947_v46 = vmax.f32 %v2758_v45, 0.0  ;;  %3098 = vst [vmem:[%s3850_s13 + $0x2d8] sm:$0xff] %v2998_v16  ;;  %v2999_v49 = vmax.f32 %v2888_v47, 0.0 }
 0x1c2   : > { %v2760_v48 = vpop.f32.mrf.mxu0  ;;  %v2890_v51 = vpop.f32.mrf.mxu1 }
 0x1c3   : > { %3047 = vst [vmem:[%s3850_s13 + $0x140] sm:$0xff] %v2947_v46  ;;  %v2948_v50 = vmax.f32 %v2760_v48, 0.0  ;;  %3099 = vst [vmem:[%s3850_s13 + $0x2e0] sm:$0xff] %v2999_v49  ;;  %v3000_v53 = vmax.f32 %v2890_v51, 0.0 }
 0x1c4   : > { %v2762_v52 = vpop.f32.mrf.mxu0  ;;  %v2892_v55 = vpop.f32.mrf.mxu1 }
 0x1c5   : > { %3048 = vst [vmem:[%s3850_s13 + $0x148] sm:$0xff] %v2948_v50  ;;  %v2949_v54 = vmax.f32 %v2762_v52, 0.0  ;;  %3100 = vst [vmem:[%s3850_s13 + $0x2e8] sm:$0xff] %v3000_v53  ;;  %v3001_v57 = vmax.f32 %v2892_v55, 0.0 }
 0x1c6   : > { %v2764_v56 = vpop.f32.mrf.mxu0  ;;  %v2894_v58 = vpop.f32.mrf.mxu1 }
 0x1c7   : > { %3049 = vst [vmem:[%s3850_s13 + $0x150] sm:$0xff] %v2949_v54  ;;  %v2950_v7 = vmax.f32 %v2764_v56, 0.0  ;;  %3101 = vst [vmem:[%s3850_s13 + $0x2f0] sm:$0xff] %v3001_v57  ;;  %v3002_v60 = vmax.f32 %v2894_v58, 0.0 }
 0x1c8   : > { %v2768_v59 = vpop.f32.mrf.mxu0  ;;  %v2898_v62 = vpop.f32.mrf.mxu1 }
 0x1c9   : > { %3050 = vst [vmem:[%s3850_s13 + $0x158] sm:$0xff] %v2950_v7  ;;  %v2951_v61 = vmax.f32 %v2768_v59, 0.0  ;;  %3102 = vst [vmem:[%s3850_s13 + $0x2f8] sm:$0xff] %v3002_v60  ;;  %v3003_v0 = vmax.f32 %v2898_v62, 0.0 }
 0x1ca   : > { %v2770_v63 = vpop.f32.mrf.mxu0  ;;  %v2900_v4 = vpop.f32.mrf.mxu1 }
 0x1cb   : > { %3051 = vst [vmem:[%s3850_s13 + $0x160] sm:$0xff] %v2951_v61  ;;  %v2952_v1 = vmax.f32 %v2770_v63, 0.0  ;;  %3103 = vst [vmem:[%s3850_s13 + $0x300] sm:$0xff] %v3003_v0  ;;  %v3004_v8 = vmax.f32 %v2900_v4, 0.0 }
 0x1cc   : > { %v2772_v5 = vpop.f32.mrf.mxu0  ;;  %v2902_v10 = vpop.f32.mrf.mxu1 }
 0x1cd   : > { %3052 = vst [vmem:[%s3850_s13 + $0x168] sm:$0xff] %v2952_v1  ;;  %v2953_v9 = vmax.f32 %v2772_v5, 0.0  ;;  %3104 = vst [vmem:[%s3850_s13 + $0x308] sm:$0xff] %v3004_v8  ;;  %v3005_v12 = vmax.f32 %v2902_v10, 0.0 }
 0x1ce   : > { %v2774_v11 = vpop.f32.mrf.mxu0  ;;  %v2904_v14 = vpop.f32.mrf.mxu1 }
 0x1cf   : > { %3053 = vst [vmem:[%s3850_s13 + $0x170] sm:$0xff] %v2953_v9  ;;  %v2954_v13 = vmax.f32 %v2774_v11, 0.0  ;;  %3105 = vst [vmem:[%s3850_s13 + $0x310] sm:$0xff] %v3005_v12  ;;  %v3006_v15 = vmax.f32 %v2904_v14, 0.0 }
 0x1d0   : > { %v2778_v30 = vpop.f32.mrf.mxu0 }
 0x1d1   : > { %3054 = vst [vmem:[%s3850_s13 + $0x178] sm:$0xff] %v2954_v13  ;;  %v2955_v17 = vmax.f32 %v2778_v30, 0.0  ;;  %3106 = vst [vmem:[%s3850_s13 + $0x318] sm:$0xff] %v3006_v15 }
 0x1d2   : > { %v2780_v18 = vpop.f32.mrf.mxu0 }
 0x1d3   : > { %3055 = vst [vmem:[%s3850_s13 + $0x180] sm:$0xff] %v2955_v17  ;;  %v2956_v19 = vmax.f32 %v2780_v18, 0.0 }
 0x1d4   : > { %v2782_v20 = vpop.f32.mrf.mxu0 }
 0x1d5   : > { %3056 = vst [vmem:[%s3850_s13 + $0x188] sm:$0xff] %v2956_v19  ;;  %v2957_v21 = vmax.f32 %v2782_v20, 0.0 }
 0x1d6   : > { %v2784_v22 = vpop.f32.mrf.mxu0 }
 0x1d7   : > { %3057 = vst [vmem:[%s3850_s13 + $0x190] sm:$0xff] %v2957_v21  ;;  %v2958_v23 = vmax.f32 %v2784_v22, 0.0 }
 0x1d9   : > { %3058 = vst [vmem:[%s3850_s13 + $0x198] sm:$0xff] %v2958_v23 }
 0x1da PF: > { %s31_s25 = sadd.s32 1, %s3403_s25  }
 0x1db   : > { %p28_p4 = scmp.ge.s32.totalorder %s31_s25, 4  }
 0x1dd   :  { %30 = sbr.rel (!%p28_p4) target bundleno = 3 (0x3), region = 236 }

</bundles_post_ra>
